<compile_context>
chip_gen: v7x
topology: tpu7x:2x2x1
jax: 0.10.0
libtpu: 0.0.40
codegen_flags: <defaults>
</compile_context>

<pallas_src>
import functools

import jax
import jax.numpy as jnp
from jax import lax
from jax.experimental import pallas as pl
from jax.experimental.pallas import tpu as pltpu

_MIB = 1024 * 1024


# --------------------------- kernel bodies ---------------------------
def _conv3(v, w, zero_m1, zero_p1):
    """3-tap conv (stride 1, pad 1) as three accumulated MXU dots.

    v       : (C, N) operand in the MXU compute dtype.
    w       : (Cout, 3*C) tap-major weights: w[:, k*C + ci] = w_orig[:, ci, k].
    zero_m1 : (C, N) bool, True where the l-1 tap crosses a left boundary.
    zero_p1 : (C, N) bool, True where the l+1 tap crosses a right boundary.
    Returns (Cout, N) float32.
    """
    c, n = v.shape
    # Lane-axis rolls with non-negative shifts (XLU work, off the VALU/vst path).
    v_m1 = jnp.where(zero_m1, 0.0, pltpu.roll(v, shift=1, axis=1))
    v_p1 = jnp.where(zero_p1, 0.0, pltpu.roll(v, shift=n - 1, axis=1))
    acc = jnp.dot(w[:, 0:c], v_m1, preferred_element_type=jnp.float32)
    acc = acc + jnp.dot(w[:, c:2 * c], v, preferred_element_type=jnp.float32)
    acc = acc + jnp.dot(w[:, 2 * c:3 * c], v_p1, preferred_element_type=jnp.float32)
    return acc


def _block_kernel_packed(x_ref, w1_ref, w2_ref, o_ref, *, L, same_channels):
    """Lane-packed path. x_ref: (Cin, Bt*L), w1: (Cout,3Cin), w2: (Cout,3Cout), o: (Cout, Bt*L)."""
    cin, n = x_ref.shape
    cout = o_ref.shape[0]
    dot_dtype = w1_ref.dtype

    pos = lax.broadcasted_iota(jnp.int32, (1, n), 1) % L
    zm1 = pos == 0            # l-1 tap would read the previous batch element / off the edge
    zp1 = pos == L - 1        # l+1 tap would read the next batch element / off the edge
    # Pre-broadcast once per channel count (JAX does not CSE broadcast_in_dim).
    zm1_i = jnp.broadcast_to(zm1, (cin, n))
    zp1_i = jnp.broadcast_to(zp1, (cin, n))
    zm1_o = jnp.broadcast_to(zm1, (cout, n))
    zp1_o = jnp.broadcast_to(zp1, (cout, n))

    x_f32 = x_ref[...].astype(jnp.float32)
    h = _conv3(x_f32.astype(dot_dtype), w1_ref[...], zm1_i, zp1_i)   # conv1(x), pre-ReLU
    a = jnp.maximum(h, 0.0)
    g = _conv3(a.astype(dot_dtype), w2_ref[...], zm1_o, zp1_o)       # conv2(relu(conv1(x)))
    res = x_f32 if same_channels else h                              # residual source
    o_ref[...] = jnp.maximum(res + g, 0.0).astype(o_ref.dtype)


def _block_kernel_ncl(x_ref, w1_ref, w2_ref, o_ref, *, same_channels):
    """NCL fallback path (large L). x_ref: (Bt, Cin, L), o_ref: (Bt, Cout, L)."""
    bt, cin, L = x_ref.shape
    cout = o_ref.shape[1]
    dot_dtype = w1_ref.dtype

    col = lax.broadcasted_iota(jnp.int32, (1, L), 1)
    zm1 = col == 0
    zp1 = col == L - 1
    # Hoist + pre-broadcast masks and weights once per grid step (loop-invariant).
    zm1_i = jnp.broadcast_to(zm1, (cin, L))
    zp1_i = jnp.broadcast_to(zp1, (cin, L))
    zm1_o = jnp.broadcast_to(zm1, (cout, L))
    zp1_o = jnp.broadcast_to(zp1, (cout, L))
    w1 = w1_ref[...]
    w2 = w2_ref[...]

    def body(b, carry):
        x_f32 = x_ref[b].astype(jnp.float32)                          # (Cin, L)
        h = _conv3(x_f32.astype(dot_dtype), w1, zm1_i, zp1_i)
        a = jnp.maximum(h, 0.0)
        g = _conv3(a.astype(dot_dtype), w2, zm1_o, zp1_o)
        res = x_f32 if same_channels else h
        o_ref[b] = jnp.maximum(res + g, 0.0).astype(o_ref.dtype)
        return carry

    lax.fori_loop(0, bt, body, 0, unroll=True)


# --------------------------- wrapper ---------------------------
def _vmem_limit_bytes():
    # Generation-aware scoped-VMEM limit: ~75% of physical, clipped to [32, 100] MiB
    # (v7x: 64 MiB physical -> 48 MiB; v5e/v6e: 128 MiB -> ~96-100 MiB).
    try:
        cap = int(pltpu.get_tpu_info().vmem_capacity_bytes)
    except Exception:
        cap = 64 * _MIB  # conservative fallback (v7x per-TensorCore VMEM)
    return max(32 * _MIB, min(int(cap * 0.75), 100 * _MIB))


def _pick_batch_tile(B, L, stream_b, work_b, packed, budget):
    """Pick a divisor of B: >= ~1 MiB streamed/step, grid >= 2 steps if possible,
    double-buffered tiles within the VMEM budget, lane-aligned when packed."""
    divisors = [d for d in range(1, B + 1) if B % d == 0]

    def ok(d):
        if packed and (d * L) % 128 != 0 and d != B:
            return False  # (8,128) constraint on the packed lane block
        return d * work_b <= budget

    valid = [d for d in divisors if ok(d)]
    if not valid:
        return None
    prefer = [d for d in valid if B // d >= 2] or valid   # keep >=2 steps for v7x megacore
    big = [d for d in prefer if d * stream_b >= 1 * _MIB]
    return min(big) if big else max(prefer)


def convolution_block(x_ncl, w1, w2, *, batch_tile=None, compute_dtype=None,
                      pack_lanes=None, out_dtype=None):
    """ConvolutionBlock forward. x_ncl: (B, Cin, L); w1: (Cout, Cin, 3); w2: (Cout, Cout, 3)."""
    B, Cin, L = x_ncl.shape
    Cout = w1.shape[0]
    assert w1.shape == (Cout, Cin, 3) and w2.shape == (Cout, Cout, 3)
    same_channels = (Cin == Cout)
    if compute_dtype is None:
        compute_dtype = x_ncl.dtype   # f32 default; pass jnp.bfloat16 for bf16 streaming
    if out_dtype is None:
        out_dtype = x_ncl.dtype
    if pack_lanes is None:
        pack_lanes = L < 512          # small L: pack the batch into lanes (lane-dense stores)

    # Stream activations in the narrower of (input dtype, compute dtype).
    stream_dtype = (compute_dtype
                    if jnp.dtype(compute_dtype).itemsize < jnp.dtype(x_ncl.dtype).itemsize
                    else x_ncl.dtype)

    vmem_limit = _vmem_limit_bytes()
    stream_b = (Cin * jnp.dtype(stream_dtype).itemsize
                + Cout * jnp.dtype(out_dtype).itemsize) * L      # HBM bytes per batch element
    work_b = 2 * stream_b + 8 * (Cin + Cout) * L * 4             # dbl-buffered tiles + f32 temps
    budget = vmem_limit - 6 * Cout * (Cin + Cout) * 4            # room for resident weights

    if batch_tile is None:
        bt = _pick_batch_tile(B, L, stream_b, work_b, pack_lanes, budget)
        if bt is None and pack_lanes:
            pack_lanes = False
            bt = _pick_batch_tile(B, L, stream_b, work_b, False, budget)
        if bt is None:
            # TODO(synk): L-tile grid axis with a 1-column halo for shapes where even one
            # (Cin, L) slab overflows the VMEM budget; fall back to Bt=1 for now.
            pack_lanes = False
            bt = 1
        batch_tile = bt
    else:
        assert B % batch_tile == 0, "batch_tile must divide the batch"
        if pack_lanes and (batch_tile * L) % 128 != 0 and batch_tile != B:
            pack_lanes = False  # keep the (8,128) packed-block constraint satisfiable

    # Tap-major flat weights, VMEM-resident across grid steps: W[co, k*C + ci] = w[co, ci, k].
    w1f = jnp.transpose(w1, (0, 2, 1)).reshape(Cout, 3 * Cin).astype(compute_dtype)
    w2f = jnp.transpose(w2, (0, 2, 1)).reshape(Cout, 3 * Cout).astype(compute_dtype)

    grid = (B // batch_tile,)
    cparams = pltpu.CompilerParams(
        dimension_semantics=("parallel",),
        vmem_limit_bytes=vmem_limit,
    )

    if pack_lanes:
        # Layout plumbing only: one transpose each way so the kernel sees a lane-dense
        # (C, B*L) slab (MXU N = Bt*L, unmasked stores) instead of Bt masked (Cout, L) stores.
        xp = jnp.transpose(x_ncl, (1, 0, 2)).reshape(Cin, B * L).astype(stream_dtype)
        nt = batch_tile * L
        kernel = functools.partial(_block_kernel_packed, L=L, same_channels=same_channels)
        out_p = pl.pallas_call(
            kernel,
            out_shape=jax.ShapeDtypeStruct((Cout, B * L), out_dtype),
            grid_spec=pltpu.PrefetchScalarGridSpec(
                num_scalar_prefetch=0,
                grid=grid,
                in_specs=[
                    pl.BlockSpec((Cin, nt), lambda i: (0, i)),
                    pl.BlockSpec((Cout, 3 * Cin), lambda i: (0, 0)),    # VMEM-resident
                    pl.BlockSpec((Cout, 3 * Cout), lambda i: (0, 0)),   # VMEM-resident
                ],
                out_specs=pl.BlockSpec((Cout, nt), lambda i: (0, i)),
            ),
            compiler_params=cparams,
        )(xp, w1f, w2f)
        return jnp.transpose(out_p.reshape(Cout, B, L), (1, 0, 2))

    # NCL-native path (large L): lane dim is already L >= 512, no packing needed.
    xs = x_ncl.astype(stream_dtype)
    kernel = functools.partial(_block_kernel_ncl, same_channels=same_channels)
    return pl.pallas_call(
        kernel,
        out_shape=jax.ShapeDtypeStruct((B, Cout, L), out_dtype),
        grid_spec=pltpu.PrefetchScalarGridSpec(
            num_scalar_prefetch=0,
            grid=grid,
            in_specs=[
                pl.BlockSpec((batch_tile, Cin, L), lambda b: (b, 0, 0)),
                pl.BlockSpec((Cout, 3 * Cin), lambda b: (0, 0)),        # VMEM-resident
                pl.BlockSpec((Cout, 3 * Cout), lambda b: (0, 0)),       # VMEM-resident
            ],
            out_specs=pl.BlockSpec((batch_tile, Cout, L), lambda b: (b, 0, 0)),
        ),
        compiler_params=cparams,
    )(xs, w1f, w2f)


# ---------------- pure-JAX reference (independent check) ----------------
def _conv1d_ref(x_ncl, w):
    # x: (B, Cin, L), w: (Cout, Cin, 3); stride 1, pad 1, no bias.
    return lax.conv_general_dilated(
        x_ncl, w, window_strides=(1,), padding=[(1, 1)],
        dimension_numbers=("NCH", "OIH", "NCH"))


def _block_ref(x_ncl, w1, w2):
    in_c, out_c = w1.shape[1], w1.shape[0]
    if in_c == out_c:
        y = _conv1d_ref(x_ncl, w1)
        y = jax.nn.relu(y)
        y = _conv1d_ref(y, w2)
        return jax.nn.relu(x_ncl + y)
    else:
        h = _conv1d_ref(x_ncl, w1)
        y = jax.nn.relu(h)
        y = _conv1d_ref(y, w2)
        return jax.nn.relu(h + y)


def _init_weights(key, in_channels, out_channels):
    # PyTorch Conv1d default: U(-sqrt(k), sqrt(k)), k = 1/(in_channels * kernel_size)
    k1, k2 = jax.random.split(key)
    b1 = (1.0 / (in_channels * 3)) ** 0.5
    b2 = (1.0 / (out_channels * 3)) ** 0.5
    w1 = jax.random.uniform(k1, (out_channels, in_channels, 3), jnp.float32, -b1, b1)
    w2 = jax.random.uniform(k2, (out_channels, out_channels, 3), jnp.float32, -b2, b2)
    return w1, w2


if __name__ == "__main__":
    key = jax.random.PRNGKey(0)
    kx1, kw1, kx2, kw2 = jax.random.split(key, 4)
    B, L = 2, 16

    # Case 1: in_channels == out_channels (identity residual), lane-packed path.
    Cin1 = Cout1 = 8
    x1 = jax.random.normal(kx1, (B, Cin1, L), jnp.float32)
    w1a, w1b = _init_weights(kw1, Cin1, Cout1)
    out1 = jax.block_until_ready(convolution_block(x1, w1a, w1b))
    ref1 = _block_ref(x1, w1a, w1b)
    assert out1.shape == (B, Cout1, L)
    assert jnp.allclose(out1, ref1, atol=1e-5), "case1 mismatch"

    # Case 2: in_channels != out_channels (pre-ReLU conv1 residual), Cin not sublane-aligned.
    Cin2, Cout2 = 4, 8
    x2 = jax.random.normal(kx2, (B, Cin2, L), jnp.float32)
    w2a, w2b = _init_weights(kw2, Cin2, Cout2)
    out2 = jax.block_until_ready(convolution_block(x2, w2a, w2b))
    ref2 = _block_ref(x2, w2a, w2b)
    assert out2.shape == (B, Cout2, L)
    assert jnp.allclose(out2, ref2, atol=1e-5), "case2 mismatch"

    # Case 3: NCL fallback path (large-L layout) with a multi-element batch tile,
    # exercising the fori_loop body.
    out3 = jax.block_until_ready(
        convolution_block(x1, w1a, w1b, pack_lanes=False, batch_tile=2))
    assert out3.shape == (B, Cout1, L)
    assert jnp.allclose(out3, ref1, atol=1e-5), "case3 mismatch"

    print("KERNEL_OK")
</pallas_src>

<mosaic_0001>
module attributes {stable_mosaic.version = 11 : i64} {
  func.func @_block_kernel_packed(%arg0: i32, %arg1: memref<8x32xf32, #tpu.memory_space<vmem>>, %arg2: memref<8x24xf32, #tpu.memory_space<vmem>>, %arg3: memref<8x24xf32, #tpu.memory_space<vmem>>, %arg4: memref<8x32xf32, #tpu.memory_space<vmem>>) attributes {dimension_semantics = [#tpu.dimension_semantics<parallel>], iteration_bounds = array<i64: 1>, scalar_prefetch = 0 : i64, scratch_operands = 0 : i64, tpu.core_type = #tpu.core_type<tc>, window_params = [{transform_indices = @transform_0, window_bounds = array<i64: 8, 32>}, {pipeline_mode = #tpu.pipeline_mode<synchronous>, transform_indices = @transform_1, window_bounds = array<i64: 8, 24>}, {pipeline_mode = #tpu.pipeline_mode<synchronous>, transform_indices = @transform_2, window_bounds = array<i64: 8, 24>}, {transform_indices = @transform_3, window_bounds = array<i64: 8, 32>}]} {
    %0 = tpu.iota {dimensions = array<i32: 1>} : vector<1x32xi32>
    %c16_i32 = arith.constant 16 : i32
    %c0_i32 = arith.constant 0 : i32
    %1 = arith.cmpi eq, %c16_i32, %c0_i32 : i32
    %c1_i32 = arith.constant 1 : i32
    %2 = arith.select %1, %c1_i32, %c16_i32 : i32
    %3 = vector.broadcast %2 : i32 to vector<1x32xi32>
    %4 = arith.remsi %0, %3 : vector<1x32xi32>
    %c0_i32_0 = arith.constant 0 : i32
    %5 = vector.broadcast %c0_i32_0 : i32 to vector<1x32xi32>
    %6 = arith.cmpi ne, %4, %5 : vector<1x32xi32>
    %c0_i32_1 = arith.constant 0 : i32
    %7 = vector.broadcast %c0_i32_1 : i32 to vector<1x32xi32>
    %8 = arith.cmpi slt, %4, %7 : vector<1x32xi32>
    %c0_i32_2 = arith.constant 0 : i32
    %9 = arith.cmpi slt, %2, %c0_i32_2 : i32
    %10 = vector.broadcast %9 : i1 to vector<1x32xi1>
    %11 = vector.broadcast %10 : vector<1x32xi1> to vector<1x32xi1>
    %12 = arith.xori %8, %11 : vector<1x32xi1>
    %13 = arith.andi %12, %6 : vector<1x32xi1>
    %14 = vector.broadcast %2 : i32 to vector<1x32xi32>
    %15 = arith.addi %4, %14 : vector<1x32xi32>
    %16 = arith.select %13, %15, %4 : vector<1x32xi1>, vector<1x32xi32>
    %c0_i32_3 = arith.constant 0 : i32
    %17 = vector.broadcast %c0_i32_3 : i32 to vector<1x32xi32>
    %18 = arith.cmpi eq, %16, %17 : vector<1x32xi32>
    %c15_i32 = arith.constant 15 : i32
    %19 = vector.broadcast %c15_i32 : i32 to vector<1x32xi32>
    %20 = arith.cmpi eq, %16, %19 : vector<1x32xi32>
    %21 = vector.shape_cast %18 : vector<1x32xi1> to vector<1x32xi1>
    %22 = vector.broadcast %21 : vector<1x32xi1> to vector<8x32xi1>
    %23 = vector.shape_cast %20 : vector<1x32xi1> to vector<1x32xi1>
    %24 = vector.broadcast %23 : vector<1x32xi1> to vector<8x32xi1>
    %25 = vector.shape_cast %18 : vector<1x32xi1> to vector<1x32xi1>
    %26 = vector.broadcast %25 : vector<1x32xi1> to vector<8x32xi1>
    %27 = vector.shape_cast %20 : vector<1x32xi1> to vector<1x32xi1>
    %28 = vector.broadcast %27 : vector<1x32xi1> to vector<8x32xi1>
    %c0 = arith.constant 0 : index
    %c0_4 = arith.constant 0 : index
    %29 = vector.load %arg1[%c0, %c0_4] : memref<8x32xf32, #tpu.memory_space<vmem>>, vector<8x32xf32>
    %c0_5 = arith.constant 0 : index
    %c0_6 = arith.constant 0 : index
    %30 = vector.load %arg2[%c0_5, %c0_6] : memref<8x24xf32, #tpu.memory_space<vmem>>, vector<8x24xf32>
    %c1_i32_7 = arith.constant 1 : i32
    %31 = tpu.dynamic_rotate %29 by %c1_i32_7 dim 1 : vector<8x32xf32>, i32 -> vector<8x32xf32>
    %cst = arith.constant 0.000000e+00 : f32
    %32 = vector.broadcast %cst : f32 to vector<8x32xf32>
    %33 = arith.select %22, %32, %31 : vector<8x32xi1>, vector<8x32xf32>
    %c31_i32 = arith.constant 31 : i32
    %34 = tpu.dynamic_rotate %29 by %c31_i32 dim 1 : vector<8x32xf32>, i32 -> vector<8x32xf32>
    %cst_8 = arith.constant 0.000000e+00 : f32
    %35 = vector.broadcast %cst_8 : f32 to vector<8x32xf32>
    %36 = arith.select %24, %35, %34 : vector<8x32xi1>, vector<8x32xf32>
    %37 = vector.extract_strided_slice %30 {offsets = [0, 0], sizes = [8, 8], strides = [1, 1]} : vector<8x24xf32> to vector<8x8xf32>
    %cst_9 = arith.constant dense<0.000000e+00> : vector<8x32xf32>
    %38 = tpu.matmul %37, %33, %cst_9 {dimension_numbers = #tpu.dot_dimension_numbers<[1], [0], [0], [1], [0, 0, 1, 1], [], []>} : vector<8x8xf32>, vector<8x32xf32>, vector<8x32xf32> -> vector<8x32xf32>
    %39 = vector.extract_strided_slice %30 {offsets = [0, 8], sizes = [8, 8], strides = [1, 1]} : vector<8x24xf32> to vector<8x8xf32>
    %cst_10 = arith.constant dense<0.000000e+00> : vector<8x32xf32>
    %40 = tpu.matmul %39, %29, %cst_10 {dimension_numbers = #tpu.dot_dimension_numbers<[1], [0], [0], [1], [0, 0, 1, 1], [], []>} : vector<8x8xf32>, vector<8x32xf32>, vector<8x32xf32> -> vector<8x32xf32>
    %41 = arith.addf %38, %40 : vector<8x32xf32>
    %42 = vector.extract_strided_slice %30 {offsets = [0, 16], sizes = [8, 8], strides = [1, 1]} : vector<8x24xf32> to vector<8x8xf32>
    %cst_11 = arith.constant dense<0.000000e+00> : vector<8x32xf32>
    %43 = tpu.matmul %42, %36, %cst_11 {dimension_numbers = #tpu.dot_dimension_numbers<[1], [0], [0], [1], [0, 0, 1, 1], [], []>} : vector<8x8xf32>, vector<8x32xf32>, vector<8x32xf32> -> vector<8x32xf32>
    %44 = arith.addf %41, %43 : vector<8x32xf32>
    %cst_12 = arith.constant 0.000000e+00 : f32
    %45 = vector.broadcast %cst_12 : f32 to vector<8x32xf32>
    %46 = arith.maximumf %44, %45 : vector<8x32xf32>
    %c0_13 = arith.constant 0 : index
    %c0_14 = arith.constant 0 : index
    %47 = vector.load %arg3[%c0_13, %c0_14] : memref<8x24xf32, #tpu.memory_space<vmem>>, vector<8x24xf32>
    %c1_i32_15 = arith.constant 1 : i32
    %48 = tpu.dynamic_rotate %46 by %c1_i32_15 dim 1 : vector<8x32xf32>, i32 -> vector<8x32xf32>
    %cst_16 = arith.constant 0.000000e+00 : f32
    %49 = vector.broadcast %cst_16 : f32 to vector<8x32xf32>
    %50 = arith.select %26, %49, %48 : vector<8x32xi1>, vector<8x32xf32>
    %c31_i32_17 = arith.constant 31 : i32
    %51 = tpu.dynamic_rotate %46 by %c31_i32_17 dim 1 : vector<8x32xf32>, i32 -> vector<8x32xf32>
    %cst_18 = arith.constant 0.000000e+00 : f32
    %52 = vector.broadcast %cst_18 : f32 to vector<8x32xf32>
    %53 = arith.select %28, %52, %51 : vector<8x32xi1>, vector<8x32xf32>
    %54 = vector.extract_strided_slice %47 {offsets = [0, 0], sizes = [8, 8], strides = [1, 1]} : vector<8x24xf32> to vector<8x8xf32>
    %cst_19 = arith.constant dense<0.000000e+00> : vector<8x32xf32>
    %55 = tpu.matmul %54, %50, %cst_19 {dimension_numbers = #tpu.dot_dimension_numbers<[1], [0], [0], [1], [0, 0, 1, 1], [], []>} : vector<8x8xf32>, vector<8x32xf32>, vector<8x32xf32> -> vector<8x32xf32>
    %56 = vector.extract_strided_slice %47 {offsets = [0, 8], sizes = [8, 8], strides = [1, 1]} : vector<8x24xf32> to vector<8x8xf32>
    %cst_20 = arith.constant dense<0.000000e+00> : vector<8x32xf32>
    %57 = tpu.matmul %56, %46, %cst_20 {dimension_numbers = #tpu.dot_dimension_numbers<[1], [0], [0], [1], [0, 0, 1, 1], [], []>} : vector<8x8xf32>, vector<8x32xf32>, vector<8x32xf32> -> vector<8x32xf32>
    %58 = arith.addf %55, %57 : vector<8x32xf32>
    %59 = vector.extract_strided_slice %47 {offsets = [0, 16], sizes = [8, 8], strides = [1, 1]} : vector<8x24xf32> to vector<8x8xf32>
    %cst_21 = arith.constant dense<0.000000e+00> : vector<8x32xf32>
    %60 = tpu.matmul %59, %53, %cst_21 {dimension_numbers = #tpu.dot_dimension_numbers<[1], [0], [0], [1], [0, 0, 1, 1], [], []>} : vector<8x8xf32>, vector<8x32xf32>, vector<8x32xf32> -> vector<8x32xf32>
    %61 = arith.addf %58, %60 : vector<8x32xf32>
    %62 = arith.addf %29, %61 : vector<8x32xf32>
    %cst_22 = arith.constant 0.000000e+00 : f32
    %63 = vector.broadcast %cst_22 : f32 to vector<8x32xf32>
    %64 = arith.maximumf %62, %63 : vector<8x32xf32>
    %c0_23 = arith.constant 0 : index
    %c0_24 = arith.constant 0 : index
    %65 = vector.load %arg4[%c0_23, %c0_24] : memref<8x32xf32, #tpu.memory_space<vmem>>, vector<8x32xf32>
    tpu.vector_store %arg4[%c0_23, %c0_24], %64 {strides = array<i32>} : memref<8x32xf32, #tpu.memory_space<vmem>>, vector<8x32xf32>,
    return
  }
  func.func @transform_0(%arg0: i32) -> (i32, i32) {
    %c0_i32 = arith.constant 0 : i32
    %c0_i32_0 = arith.constant 0 : i32
    return %c0_i32, %arg0 : i32, i32
  }
  func.func @transform_1(%arg0: i32) -> (i32, i32) {
    %c0_i32 = arith.constant 0 : i32
    %c0_i32_0 = arith.constant 0 : i32
    %c0_i32_1 = arith.constant 0 : i32
    return %c0_i32, %c0_i32_0 : i32, i32
  }
  func.func @transform_2(%arg0: i32) -> (i32, i32) {
    %c0_i32 = arith.constant 0 : i32
    %c0_i32_0 = arith.constant 0 : i32
    %c0_i32_1 = arith.constant 0 : i32
    return %c0_i32, %c0_i32_0 : i32, i32
  }
  func.func @transform_3(%arg0: i32) -> (i32, i32) {
    %c0_i32 = arith.constant 0 : i32
    %c0_i32_0 = arith.constant 0 : i32
    return %c0_i32, %arg0 : i32, i32
  }
}

</mosaic_0001>

<bundles_post_ra>
// kernel: tpu_custom_call.1
= control target key start
LH: loop header
LB: loop body
LE: loop exit
PB: predicated region body
PF: predicated region fallthrough
CT: control target
= control target key end

     0   :  { %8 = vsyncpa [#allocation3], 0  ;;  %s879_s0 = inlined_call_operand.hbm [shape: f32[8,32], index: 0, kind: input, shape index: {}]   ;;  %s880_s1 = inlined_call_operand.hbm [shape: f32[8,24], index: 1, kind: input, shape index: {}]   ;;  %s881_s2 = inlined_call_operand.hbm [shape: f32[8,24], index: 2, kind: input, shape index: {}]   ;;  %s882_s3 = inlined_call_operand.hbm [shape: f32[8,32], index: 3, kind: output, shape index: {}]  }
   0x1   :  { %9 = vsyncpa [#allocation6], 0 }
   0x2   :  { %10 = vsyncpa [#allocation4], 0  ;;  %s737_s12 = smov [#allocation5]   ;;  %s738_s14 = smov [#allocation2]  }
   0x3   :  { %s27_s13 = sshll.u32 %s737_s12, 4  ;;  %s17_s15 = sshll.u32 %s738_s14, 4  ;;  %s28_s13 = int_to_ptr.vmem [resolvable:$true] %s27_s13  ;;  %s18_s15 = int_to_ptr.vmem [resolvable:$true] %s17_s15 }
   0x4   :  { %s643_s18 = scalar_lea.hbm %s880_s1, 128 }
   0x5   :  { %p644_p0 = scmp.ne.s32.totalorder %s880_s1, %s643_s18  ;;  %p647_p1 = scmp.lt.u32.totalorder %s643_s18, %s880_s1 }
   0x7   :  { %p649_p2 = pnand %p647_p1, %p644_p0 }
   0x9   :  { %652 = shalt.err (!%p649_p2)
}
   0xa   :  { %s653_s23 = scalar_lea.vmem %s28_s13, 128  ;;  %p658_p4 = scmp.lt.s32.totalorder %s28_s13, %s28_s13 }
   0xb   :  { %p654_p3 = scmp.ne.s32.totalorder %s28_s13, %s653_s23  ;;  %p659_p5 = scmp.lt.s32.totalorder %s653_s23, %s653_s23 }
   0xd   :  { %p660_p6 = por %p659_p5, %p658_p4 }
   0xf   :  { %p661_p7 = pnand %p660_p6, %p654_p3 }
  0x11   :  { %664 = shalt.err (!%p661_p7)
}
  0x12   :  { %30 = dma.hbm_to_vmem [thread:$0]  %s880_s1, 128, %s28_s13, [#allocation6]  }
  0x13   :  { %s665_s28 = scalar_lea.hbm %s879_s0, 128 }
  0x14   :  { %p666_p8 = scmp.ne.s32.totalorder %s879_s0, %s665_s28  ;;  %p669_p9 = scmp.lt.u32.totalorder %s665_s28, %s879_s0 }
  0x16   :  { %p671_p10 = pnand %p669_p9, %p666_p8 }
  0x18   :  { %674 = shalt.err (!%p671_p10)
}
  0x19   :  { %s675_s6 = scalar_lea.vmem %s18_s15, 128  ;;  %p680_p12 = scmp.lt.s32.totalorder %s18_s15, %s18_s15 }
  0x1a   :  { %p676_p11 = scmp.ne.s32.totalorder %s18_s15, %s675_s6  ;;  %p681_p13 = scmp.lt.s32.totalorder %s675_s6, %s675_s6 }
  0x1c   :  { %p682_p0 = por %p681_p13, %p680_p12 }
  0x1e   :  { %p683_p1 = pnand %p682_p0, %p676_p11 }
  0x20   :  { %686 = shalt.err (!%p683_p1)
}
  0x21   :  { %20 = dma.hbm_to_vmem [thread:$0]  %s879_s0, 128, %s18_s15, [#allocation3]  }
  0x22   :  { %s739_s8 = smov [#allocation7]   ;;  %s687_s12 = scalar_lea.hbm %s881_s2, 128 }
  0x23   :  { %s37_s9 = sshll.u32 %s739_s8, 4  ;;  %p688_p2 = scmp.ne.s32.totalorder %s881_s2, %s687_s12  ;;  %s38_s9 = int_to_ptr.vmem [resolvable:$true] %s37_s9 }
  0x24   :  { %p691_p3 = scmp.lt.u32.totalorder %s687_s12, %s881_s2 }
  0x26   :  { %p693_p4 = pnand %p691_p3, %p688_p2 }
  0x28   :  { %696 = shalt.err (!%p693_p4)
}
  0x29   :  { %s697_s18 = scalar_lea.vmem %s38_s9, 128  ;;  %p702_p6 = scmp.lt.s32.totalorder %s38_s9, %s38_s9 }
  0x2a   :  { %p698_p5 = scmp.ne.s32.totalorder %s38_s9, %s697_s18  ;;  %p703_p7 = scmp.lt.s32.totalorder %s697_s18, %s697_s18 }
  0x2c   :  { %p704_p8 = por %p703_p7, %p702_p6 }
  0x2e   :  { %p705_p9 = pnand %p704_p8, %p698_p5 }
  0x30   :  { %708 = shalt.err (!%p705_p9)
}
  0x31   :  { %40 = dma.hbm_to_vmem [thread:$0]  %s881_s2, 128, %s38_s9, [#allocation6]  }
  0x32   :  { %731 = dma.done.wait [#allocation3], 128  }
  0x33   :  { %732 = vsyncadd [#allocation3], 4294967168 }
  0x34   :  { %733 = dma.done.wait [#allocation6], 256  }
  0x35   :  { %734 = vsyncadd [#allocation6], 4294967040  ;;  %v804_v0 = vld [vmem:[#allocation2] sm:$0xff]  ;;  %v71_v1 = vld [vmem:[#allocation5] sm:$0xff]  ;;  %s740_s19 = smov 32   ;;  %s741_s20 = smov 120   ;;  %v50_v8 = vlaneseq }
  0x36   :  { %73 = vrot.lane.b32.xlu0 %v804_v0, %s740_s19  ;;  %89 = vrot.lane.b32.xlu1 %v71_v1, %s741_s20  ;;  %v742_v2 = vmov 0.0   ;;  %vm743_vm0 = vmmov 0   ;;  %vm72_vm1 = vcmask 1047808   ;;  %vm91_vm2 = vcmask 64512   ;;  %s744_s2 = smov 127   ;;  %s745_s21 = smov 97  }
  0x37   :  { %598 = vmatprep.subr.mxu0 %v742_v2  ;;  %600 = vmatprep.mubr.msk.f32.mxu0 %vm743_vm0, %v742_v2  ;;  %s746_s22 = smov 112   ;;  %v51_v9 = vand.u32 127, %v50_v8  ;;  %v312_v19 = vld [vmem:[#allocation7] sm:$0xff]  ;;  %s747_s23 = smov [#allocation8]   ;;  %vm552_vm5 = vcmask 261120  }
  0x38   :  { %599 = vmatpush3.msra.mxu0 %v804_v0  ;;  %613 = vmatprep.subr.mxu1 %v742_v2  ;;  %s560_s24 = sshll.u32 %s747_s23, 4  ;;  %s561_s24 = int_to_ptr.vmem [resolvable:$true] %s560_s24 }
  0x39   :  { %603 = vmatprep.subr.mxu0 %v742_v2  ;;  %615 = vmatprep.mubr.msk.f32.mxu1 %vm743_vm0, %v742_v2  ;;  %v56_v10 = vand.u32 15, %v51_v9  ;;  %s709_s25 = scalar_lea.vmem %s561_s24, 128  ;;  %p714_p11 = scmp.lt.s32.totalorder %s561_s24, %s561_s24 }
  0x3a   :  { %p710_p10 = scmp.ne.s32.totalorder %s561_s24, %s709_s25  ;;  %p715_p12 = scmp.lt.s32.totalorder %s709_s25, %s709_s25 }
  0x3b   :  { %vm828_vm3 = vcmp.ne.s32.totalorder %v56_v10, 0  ;;  %vm832_vm4 = vcmp.ne.s32.totalorder %v56_v10, 15 }
  0x3c   :  { %p716_p13 = por %p715_p12, %p714_p11 }
  0x3e   :  { %p717_p0 = pnand %p716_p13, %p710_p10 }
  0xa8   :  { %v74_v3 = vpop.permute.xlu0 %73  ;;  %v90_v4 = vpop.permute.xlu1 %89 }
  0xa9   :  { %v75_v5 = vsel %vm72_vm1, %v74_v3, %v804_v0  ;;  %601 = vmatmul.mubr.msk.f32.vlgmr.msra.gmra.mrb[0].mxu0 %vm91_vm2, %v90_v4 }
  0xaa   :  { %76 = vrot.lane.b32.xlu0 %v75_v5, %s740_s19  ;;  %605 = vmatprep.mubr.msk.f32.mxu0 %vm743_vm0, %v742_v2 }
 0x11c   :  { %v77_v6 = vpop.permute.xlu0 %76 }
 0x11d   :  { %v78_v7 = vsel %vm72_vm1, %v77_v6, %v804_v0 }
 0x11e   :  { %84 = vrot.lane.b32.xlu0 %v78_v7, %s744_s2  ;;  %80 = vrot.lane.b32.xlu1 %v78_v7, %s745_s21 }
 0x122   :  { %236 = vrot.lane.b32.xlu1 %v71_v1, %s746_s22 }
 0x190   :  { %v81_v12 = vpop.permute.xlu1 %80  ;;  %v85_v14 = vpop.permute.xlu0 %84 }
 0x191   :  { %604 = vmatpush3.msk.msra.mxu0 %vm828_vm3, %v81_v12 }
 0x192   :  { %606 = vmatmul.mubr.msk.f32.vlgmr.msra.gmra.mrb[0].mxu0 %vm91_vm2, %v71_v1  ;;  %608 = vmatprep.subr.mxu0 %v742_v2 }
 0x193   :  { %609 = vmatpush3.msk.msra.mxu0 %vm832_vm4, %v85_v14  ;;  %610 = vmatprep.mubr.msk.f32.mxu0 %vm743_vm0, %v742_v2 }
 0x194   :  { %v237_v15 = vpop.permute.xlu1 %236 }
 0x19a   :  { %611 = vmatmul.mubr.msk.f32.vlgmr.msra.gmra.mrb[0].mxu0 %vm91_vm2, %v237_v15 }
 0x26d   :  { %v306_v16 = vpop.f32.mrb[0].mxu0 }
 0x26e   :  { %v311_v17 = vmax.f32 %v306_v16, 0.0  ;;  %v612_v18 = vpop.f32.mrb[1].mxu0 }
 0x270   :  { %313 = vrot.lane.b32.xlu0 %v311_v17, %s740_s19  ;;  %614 = vmatpush3.msra.mxu1 %v311_v17 }
 0x271   :  { %618 = vmatprep.subr.mxu1 %v742_v2 }
 0x274   :  { %329 = vrot.lane.b32.xlu0 %v312_v19, %s741_s20 }
 0x2e2   :  { %v314_v20 = vpop.permute.xlu0 %313 }
 0x2e3   :  { %v315_v21 = vsel %vm72_vm1, %v314_v20, %v311_v17 }
 0x2e4   :  { %316 = vrot.lane.b32.xlu1 %v315_v21, %s740_s19 }
 0x2e6   :  { %v330_v22 = vpop.permute.xlu0 %329 }
 0x2e7   :  { %616 = vmatmul.mubr.msk.f32.vlgmr.msra.gmra.mrb[0].mxu1 %vm91_vm2, %v330_v22 }
 0x2e8   :  { %620 = vmatprep.mubr.msk.f32.mxu1 %vm743_vm0, %v742_v2 }
 0x356   :  { %v317_v23 = vpop.permute.xlu1 %316 }
 0x357   :  { %v318_v24 = vsel %vm72_vm1, %v317_v23, %v311_v17 }
 0x358   :  { %324 = vrot.lane.b32.xlu0 %v318_v24, %s744_s2  ;;  %320 = vrot.lane.b32.xlu1 %v318_v24, %s745_s21 }
 0x35c   :  { %475 = vrot.lane.b32.xlu1 %v312_v19, %s746_s22 }
 0x3ba   :  { %v399_v25 = vpop.f32.mrb[0].mxu1 }
 0x3bb   :  { %v617_v26 = vpop.f32.mrb[1].mxu1 }
 0x3ca   :  { %v321_v27 = vpop.permute.xlu1 %320  ;;  %v325_v28 = vpop.permute.xlu0 %324 }
 0x3cb   :  { %619 = vmatpush3.msk.msra.mxu1 %vm828_vm3, %v321_v27 }
 0x3cc   :  { %623 = vmatprep.subr.mxu1 %v742_v2  ;;  %621 = vmatmul.mubr.msk.f32.vlgmr.msra.gmra.mrb[2].mxu1 %vm91_vm2, %v312_v19 }
 0x3cd   :  { %624 = vmatpush3.msk.msra.mxu1 %vm832_vm4, %v325_v28  ;;  %625 = vmatprep.mubr.msk.f32.mxu1 %vm743_vm0, %v742_v2 }
 0x3ce   :  { %v476_v29 = vpop.permute.xlu1 %475 }
 0x3d0   :  { %626 = vmatmul.mubr.msk.f32.vlgmr.msra.gmra.mrb[4].mxu1 %vm91_vm2, %v476_v29 }
 0x49f   :  { %v471_v30 = vpop.f32.mrb[2].mxu1 }
 0x4a0   :  { %v472_v31 = vadd.f32 %v471_v30, %v399_v25  ;;  %v622_v32 = vpop.f32.mrb[3].mxu1 }
 0x4a3   :  { %v545_v33 = vpop.f32.mrb[4].mxu1 }
 0x4a4   :  { %v549_v34 = vadd.f32 %v545_v33, %v472_v31  ;;  %v627_v35 = vpop.f32.mrb[5].mxu1 }
 0x4a6   :  { %v550_v36 = vadd.f32 %v549_v34, %v804_v0 }
 0x4a8   :  { %v551_v37 = vmax.f32 %v550_v36, 0.0 }
 0x4aa   :  { %553 = vst.msk [vmem:[#allocation8] sm:$0xff] %vm552_vm5, %v551_v37 }
 0x4ab   :  { %720 = shalt.err (!%p717_p0)
}
 0x4ac   :  { %s721_s28 = scalar_lea.hbm %s882_s3, 128 }
 0x4ad   :  { %p722_p1 = scmp.ne.s32.totalorder %s882_s3, %s721_s28  ;;  %p725_p2 = scmp.lt.u32.totalorder %s721_s28, %s882_s3 }
 0x4af   :  { %p727_p3 = pnand %p725_p2, %p722_p1 }
 0x4b1   :  { %730 = shalt.err (!%p727_p3)
}
 0x4b2   :  { %563 = dma.vmem_to_hbm [thread:$0]  %s561_s24, 128, %s882_s3, [#allocation4]  }
 0x4b3   :  { %735 = dma.done.wait [#allocation4], 128  }
 0x4b4   :  { %736 = vsyncadd [#allocation4], 4294967168 }
 0x4b5   :  { %567 = vsyncpa [#allocation3], 1 }
 0x4b6   :  { %568 = vsyncpa [#allocation6], 1 }
 0x4b7   :  { %569 = vsyncpa [#allocation4], 1 }

</bundles_post_ra>
